<compile_context>
chip_gen: v5e
topology: v5e:2x2
jax: 0.10.0
libtpu: 0.0.40
codegen_flags: <defaults>
</compile_context>

<pallas_src>
import functools

import jax
import jax.numpy as jnp
import numpy as np
from jax.experimental import pallas as pl
from jax.experimental.pallas import tpu as pltpu


# ----------------------------- hw config -------------------------------------


def _round_up(n, m):
    return (n + m - 1) // m * m


def _tpu_generation():
    try:
        kind = jax.devices()[0].device_kind.lower()
    except Exception:
        return "unknown"
    if "v5 lite" in kind or "v5e" in kind or "v5lite" in kind:
        return "v5e"
    if "v6" in kind:
        return "v6e"
    if "7" in kind:
        return "v7x"
    return "unknown"


_GEN_CONFIG = {
    # max_block_bytes: VMEM footprint budget for one x block (in OR out).
    # vmem_limit_bytes: scoped VMEM limit handed to Mosaic (None = default).
    # min_steps: keep at least this many grid steps when B allows it
    #            (pipelining; v7x shards the parallel batch axis over 2 TCs).
    # mul_in_f32: do the gate multiply in f32 (v5e has no bf16 VALU).
    "v7x": dict(max_block_bytes=6 << 20, vmem_limit_bytes=48 << 20,
                min_steps=4, mul_in_f32=False),
    "v6e": dict(max_block_bytes=6 << 20, vmem_limit_bytes=64 << 20,
                min_steps=2, mul_in_f32=False),
    "v5e": dict(max_block_bytes=4 << 20, vmem_limit_bytes=64 << 20,
                min_steps=2, mul_in_f32=True),
    "unknown": dict(max_block_bytes=2 << 20, vmem_limit_bytes=None,
                    min_steps=2, mul_in_f32=True),
}


# ----------------------------- kernels ----------------------------------------


def _se_kernel(x_ref, w1_ref, w2_ref, o_ref, *, mul_in_f32):
    """Fused SE. Block = (bt, C, HW): pool -> FC -> ReLU -> FC -> sigmoid -> scale."""
    x = x_ref[...]                                              # (bt, C, HW)
    # Squeeze: lane reduce with f32 accumulation (no full-block upcast copy).
    pooled = jnp.sum(x, axis=-1, dtype=jnp.float32)             # (bt, C)
    # Excitation (1/HW already folded into w1 by the wrapper).
    h = jnp.maximum(
        jnp.dot(pooled, w1_ref[...], preferred_element_type=jnp.float32), 0.0)
    gate = jax.nn.sigmoid(
        jnp.dot(h, w2_ref[...], preferred_element_type=jnp.float32))  # (bt, C)
    if mul_in_f32:
        o_ref[...] = (x.astype(jnp.float32) * gate[:, :, None]).astype(o_ref.dtype)
    else:
        o_ref[...] = x * gate.astype(x.dtype)[:, :, None]


def _se_gate_kernel(x_ref, w1_ref, w2_ref, gate_ref, acc_ref, *,
                    hw_total, thw, needs_mask):
    """Spatial-tiled pool + excitation. x block = (1, C, thw), gate = (1, 1, C)."""
    hw_i = pl.program_id(1)

    @pl.when(hw_i == 0)
    def _init():
        acc_ref[...] = jnp.zeros_like(acc_ref)

    x = x_ref[...]                                              # (1, C, thw)
    if needs_mask:   # last tile may read past HW: zero the padded lanes
        pos = hw_i * thw + jax.lax.broadcasted_iota(jnp.int32, x.shape, 2)
        x = jnp.where(pos < hw_total, x, jnp.zeros_like(x))
    acc_ref[...] += jnp.sum(x, axis=-1, dtype=jnp.float32)      # (1, C)

    @pl.when(hw_i == pl.num_programs(1) - 1)
    def _finalize():
        h = jnp.maximum(
            jnp.dot(acc_ref[...], w1_ref[...],
                    preferred_element_type=jnp.float32), 0.0)
        g = jax.nn.sigmoid(
            jnp.dot(h, w2_ref[...], preferred_element_type=jnp.float32))  # (1, C)
        gate_ref[...] = g[:, None, :]


def _se_scale_kernel(x_ref, gate_ref, o_ref, *, mul_in_f32):
    x = x_ref[...]                                              # (1, C, thw)
    gate = gate_ref[...][:, 0, :]                               # (1, C) f32
    if mul_in_f32:
        o_ref[...] = (x.astype(jnp.float32) * gate[:, :, None]).astype(o_ref.dtype)
    else:
        o_ref[...] = x * gate.astype(x.dtype)[:, :, None]


# ----------------------------- wrapper ----------------------------------------


def _choose_block_batch(B, per_image_vmem, max_block_bytes, min_steps):
    """Max batch rows per block under the VMEM budget, keeping >= min_steps."""
    bt = max(1, min(B, max_block_bytes // max(per_image_vmem, 1)))
    while bt > 1 and pl.cdiv(B, bt) < min_steps:
        bt -= 1
    return bt


def se_attention(x, w1, w2, *, max_block_bytes=None):
    """SE attention forward.

    x:  (B, C, H, W), f32 or bf16 (output matches x.dtype).
    w1: (C, C//r)  -- first Linear weight, pre-transposed (W1.T), no bias.
    w2: (C//r, C)  -- second Linear weight, pre-transposed (W2.T), no bias.
    """
    B, C, H, W = x.shape
    HW = H * W
    # Fold the avg-pool 1/HW into w1 (exact: ReLU is positively homogeneous).
    # Cast to f32 first so bf16 weights do not lose precision in the fold.
    w1f = w1.astype(jnp.float32) * jnp.float32(1.0 / HW)
    w2f = w2.astype(jnp.float32)
    Cr = w1f.shape[1]

    cfg = _GEN_CONFIG.get(_tpu_generation(), _GEN_CONFIG["unknown"])
    if max_block_bytes is None:
        max_block_bytes = cfg["max_block_bytes"]
    mul_in_f32 = cfg["mul_in_f32"] or x.dtype == jnp.float32

    def compiler_params(sem):
        return pltpu.CompilerParams(dimension_semantics=sem,
                                    vmem_limit_bytes=cfg["vmem_limit_bytes"])

    xf = x.reshape(B, C, HW)            # contiguous reshape: no HBM transpose
    itemsize = x.dtype.itemsize
    # VMEM footprint of one image block (sublane pad to 8, lane pad to 128).
    per_image_vmem = _round_up(C, 8) * _round_up(HW, 128) * itemsize

    if per_image_vmem <= max_block_bytes:
        # ---- single fused kernel, several images per block ------------------
        bt = _choose_block_batch(B, per_image_vmem, max_block_bytes,
                                 cfg["min_steps"])
        kernel = functools.partial(_se_kernel, mul_in_f32=mul_in_f32)
        out = pl.pallas_call(
            kernel,
            out_shape=jax.ShapeDtypeStruct((B, C, HW), x.dtype),
            grid=(pl.cdiv(B, bt),),
            in_specs=[
                pl.BlockSpec((bt, C, HW), lambda b: (b, 0, 0)),
                pl.BlockSpec((C, Cr), lambda b: (0, 0)),
                pl.BlockSpec((Cr, C), lambda b: (0, 0)),
            ],
            out_specs=pl.BlockSpec((bt, C, HW), lambda b: (b, 0, 0)),
            compiler_params=compiler_params(("parallel",)),
        )(xf, w1f, w2f)
        return out.reshape(B, C, H, W)

    # ---- large single image: spatial-tiled two-pass path ------------------
    thw = (max_block_bytes // (_round_up(C, 8) * itemsize)) // 128 * 128
    thw = max(128, thw)
    if thw >= HW:
        thw = HW
    nhw = pl.cdiv(HW, thw)
    needs_mask = (HW % thw) != 0

    gate_kernel = functools.partial(
        _se_gate_kernel, hw_total=HW, thw=thw, needs_mask=needs_mask)
    gates = pl.pallas_call(
        gate_kernel,
        out_shape=jax.ShapeDtypeStruct((B, 1, C), jnp.float32),
        grid=(B, nhw),
        in_specs=[
            pl.BlockSpec((1, C, thw), lambda b, h: (b, 0, h)),
            pl.BlockSpec((C, Cr), lambda b, h: (0, 0)),
            pl.BlockSpec((Cr, C), lambda b, h: (0, 0)),
        ],
        out_specs=pl.BlockSpec((1, 1, C), lambda b, h: (b, 0, 0)),
        scratch_shapes=[pltpu.VMEM((1, C), jnp.float32)],
        compiler_params=compiler_params(("parallel", "arbitrary")),
    )(xf, w1f, w2f)

    scale_kernel = functools.partial(_se_scale_kernel, mul_in_f32=mul_in_f32)
    out = pl.pallas_call(
        scale_kernel,
        out_shape=jax.ShapeDtypeStruct((B, C, HW), x.dtype),
        grid=(B, nhw),
        in_specs=[
            pl.BlockSpec((1, C, thw), lambda b, h: (b, 0, h)),
            pl.BlockSpec((1, 1, C), lambda b, h: (b, 0, 0)),
        ],
        out_specs=pl.BlockSpec((1, C, thw), lambda b, h: (b, 0, h)),
        compiler_params=compiler_params(("parallel", "arbitrary")),
    )(xf, gates)
    return out.reshape(B, C, H, W)


# ----------------------------- reference --------------------------------------


def se_attention_ref(x, w1, w2):
    """Pure-JAX reference mirroring the PyTorch module (f32 math)."""
    y = jnp.mean(x.astype(jnp.float32), axis=(2, 3))            # AdaptiveAvgPool2d(1)
    y = jnp.maximum(y @ w1.astype(jnp.float32), 0.0)            # Linear + ReLU
    y = jax.nn.sigmoid(y @ w2.astype(jnp.float32))              # Linear + Sigmoid
    return x.astype(jnp.float32) * y[:, :, None, None]


# ----------------------------- test --------------------------------------------


def _make_inputs(key, B, C, H, W, reduction, dtype):
    Cr = max(1, C // reduction)
    kx, k1, k2 = jax.random.split(key, 3)
    x = jax.random.normal(kx, (B, C, H, W), dtype=jnp.float32)
    # PyTorch Linear stores (out, in); we pass W.T, deterministic synthetic init.
    w1 = jax.random.normal(k1, (C, Cr), dtype=jnp.float32) / jnp.sqrt(C)
    w2 = jax.random.normal(k2, (Cr, C), dtype=jnp.float32) / jnp.sqrt(Cr)
    return x.astype(dtype), w1, w2


if __name__ == "__main__":
    # 1) f32, fused path, HW = 256 (lane-dense).
    x, w1, w2 = _make_inputs(jax.random.PRNGKey(0), 2, 64, 16, 16, 16, jnp.float32)
    out = jax.block_until_ready(se_attention(x, w1, w2))
    np.testing.assert_allclose(np.asarray(out), np.asarray(se_attention_ref(x, w1, w2)),
                               rtol=1e-5, atol=1e-5)

    # 2) bf16 I/O (halves HBM traffic; gate multiply in input dtype on v6e/v7x).
    xb, w1b, w2b = _make_inputs(jax.random.PRNGKey(0), 2, 64, 16, 16, 16, jnp.bfloat16)
    outb = jax.block_until_ready(se_attention(xb, w1b, w2b))
    assert outb.dtype == jnp.bfloat16
    np.testing.assert_allclose(np.asarray(outb.astype(jnp.float32)),
                               np.asarray(se_attention_ref(xb, w1b, w2b)),
                               rtol=3e-2, atol=3e-2)

    # 3) Odd batch (partial last block via cdiv) + narrow 7x7 spatial, f32.
    xc, w1c, w2c = _make_inputs(jax.random.PRNGKey(0), 3, 128, 7, 7, 16, jnp.float32)
    outc = jax.block_until_ready(se_attention(xc, w1c, w2c))
    np.testing.assert_allclose(np.asarray(outc), np.asarray(se_attention_ref(xc, w1c, w2c)),
                               rtol=1e-5, atol=1e-5)

    # 4) Force the spatial-tiled (large-image) path with a tiny block budget:
    #    HW=169 -> thw=128, 2 HW tiles, masked partial tail.
    xd, w1d, w2d = _make_inputs(jax.random.PRNGKey(0), 2, 64, 13, 13, 16, jnp.float32)
    outd = jax.block_until_ready(se_attention(xd, w1d, w2d, max_block_bytes=32 * 1024))
    np.testing.assert_allclose(np.asarray(outd), np.asarray(se_attention_ref(xd, w1d, w2d)),
                               rtol=1e-5, atol=1e-5)

    print("KERNEL_OK")
</pallas_src>

<mosaic_0001>
module attributes {stable_mosaic.version = 11 : i64} {
  func.func @_se_kernel(%arg0: i32, %arg1: memref<1x64x256xf32, #tpu.memory_space<vmem>>, %arg2: memref<64x4xf32, #tpu.memory_space<vmem>>, %arg3: memref<4x64xf32, #tpu.memory_space<vmem>>, %arg4: memref<1x64x256xf32, #tpu.memory_space<vmem>>) attributes {dimension_semantics = [#tpu.dimension_semantics<parallel>], iteration_bounds = array<i64: 2>, scalar_prefetch = 0 : i64, scratch_operands = 0 : i64, tpu.core_type = #tpu.core_type<tc>, window_params = [{transform_indices = @transform_0, window_bounds = array<i64: 1, 64, 256>}, {pipeline_mode = #tpu.pipeline_mode<synchronous>, transform_indices = @transform_1, window_bounds = array<i64: 64, 4>}, {pipeline_mode = #tpu.pipeline_mode<synchronous>, transform_indices = @transform_2, window_bounds = array<i64: 4, 64>}, {transform_indices = @transform_3, window_bounds = array<i64: 1, 64, 256>}]} {
    %c0 = arith.constant 0 : index
    %c0_0 = arith.constant 0 : index
    %c0_1 = arith.constant 0 : index
    %0 = vector.load %arg1[%c0, %c0_0, %c0_1] : memref<1x64x256xf32, #tpu.memory_space<vmem>>, vector<1x64x256xf32>
    %cst = arith.constant dense<0.000000e+00> : vector<1x64xf32>
    %1 = vector.multi_reduction <add>, %0, %cst [2] : vector<1x64x256xf32> to vector<1x64xf32>
    %c0_2 = arith.constant 0 : index
    %c0_3 = arith.constant 0 : index
    %2 = vector.load %arg2[%c0_2, %c0_3] : memref<64x4xf32, #tpu.memory_space<vmem>>, vector<64x4xf32>
    %cst_4 = arith.constant dense<0.000000e+00> : vector<1x4xf32>
    %3 = tpu.matmul %1, %2, %cst_4 {dimension_numbers = #tpu.dot_dimension_numbers<[1], [0], [0], [1], [0, 0, 1, 1], [], []>} : vector<1x64xf32>, vector<64x4xf32>, vector<1x4xf32> -> vector<1x4xf32>
    %cst_5 = arith.constant 0.000000e+00 : f32
    %4 = vector.broadcast %cst_5 : f32 to vector<1x4xf32>
    %5 = arith.maximumf %3, %4 : vector<1x4xf32>
    %c0_6 = arith.constant 0 : index
    %c0_7 = arith.constant 0 : index
    %6 = vector.load %arg3[%c0_6, %c0_7] : memref<4x64xf32, #tpu.memory_space<vmem>>, vector<4x64xf32>
    %cst_8 = arith.constant dense<0.000000e+00> : vector<1x64xf32>
    %7 = tpu.matmul %5, %6, %cst_8 {dimension_numbers = #tpu.dot_dimension_numbers<[1], [0], [0], [1], [0, 0, 1, 1], [], []>} : vector<1x4xf32>, vector<4x64xf32>, vector<1x64xf32> -> vector<1x64xf32>
    %8 = arith.negf %7 : vector<1x64xf32>
    %9 = math.exp %8 : vector<1x64xf32>
    %cst_9 = arith.constant 1.000000e+00 : f32
    %10 = vector.broadcast %cst_9 : f32 to vector<1x64xf32>
    %11 = arith.addf %10, %9 : vector<1x64xf32>
    %12 = arith.divf %10, %11 : vector<1x64xf32>
    %13 = vector.shape_cast %12 : vector<1x64xf32> to vector<1x64x1xf32>
    %14 = vector.broadcast %13 : vector<1x64x1xf32> to vector<1x64x256xf32>
    %15 = arith.mulf %0, %14 : vector<1x64x256xf32>
    %c0_10 = arith.constant 0 : index
    %c0_11 = arith.constant 0 : index
    %c0_12 = arith.constant 0 : index
    %16 = vector.load %arg4[%c0_10, %c0_11, %c0_12] : memref<1x64x256xf32, #tpu.memory_space<vmem>>, vector<1x64x256xf32>
    tpu.vector_store %arg4[%c0_10, %c0_11, %c0_12], %15 {strides = array<i32>} : memref<1x64x256xf32, #tpu.memory_space<vmem>>, vector<1x64x256xf32>,
    return
  }
  func.func @transform_0(%arg0: i32) -> (i32, i32, i32) {
    %c0_i32 = arith.constant 0 : i32
    %c0_i32_0 = arith.constant 0 : i32
    %c0_i32_1 = arith.constant 0 : i32
    return %arg0, %c0_i32, %c0_i32_0 : i32, i32, i32
  }
  func.func @transform_1(%arg0: i32) -> (i32, i32) {
    %c0_i32 = arith.constant 0 : i32
    %c0_i32_0 = arith.constant 0 : i32
    %c0_i32_1 = arith.constant 0 : i32
    return %c0_i32, %c0_i32_0 : i32, i32
  }
  func.func @transform_2(%arg0: i32) -> (i32, i32) {
    %c0_i32 = arith.constant 0 : i32
    %c0_i32_0 = arith.constant 0 : i32
    %c0_i32_1 = arith.constant 0 : i32
    return %c0_i32, %c0_i32_0 : i32, i32
  }
  func.func @transform_3(%arg0: i32) -> (i32, i32, i32) {
    %c0_i32 = arith.constant 0 : i32
    %c0_i32_0 = arith.constant 0 : i32
    %c0_i32_1 = arith.constant 0 : i32
    return %arg0, %c0_i32, %c0_i32_0 : i32, i32, i32
  }
}

</mosaic_0001>

<bundles_post_ra>
// kernel: tpu_custom_call.1
= control target key start
LH: loop header
LB: loop body
LE: loop exit
PB: predicated region body
PF: predicated region fallthrough
CT: control target
= control target key end

     0   :  { %8 = vsyncpa [#allocation3], 0  ;;  %s966_s0 = inlined_call_operand.hbm [shape: f32[2,64,256], index: 0, kind: input, shape index: {}]   ;;  %s967_s1 = inlined_call_operand.vmem [shape: f32[64,4], index: 1, kind: input, shape index: {}]   ;;  %s968_s2 = inlined_call_operand.vmem [shape: f32[4,64], index: 2, kind: input, shape index: {}]   ;;  %s969_s3 = inlined_call_operand.hbm [shape: f32[2,64,256], index: 3, kind: output, shape index: {}]  }
   0x1   :  { %10 = vsyncpa [#allocation3 + $0x1], 0 }
   0x2   :  { %11 = vsyncpa [#allocation4], 0 }
   0x3   :  { %13 = vsyncpa [#allocation4 + $0x1], 0  ;;  %s725_s12 = smov 0   ;;  %s727_s13 = smov 0  }
   0x4   :  { %s729_s14 = smov 0   ;;  %s731_s15 = smov 0  }
   0x5 LB: > { %s746_s16 = sadd.s32 4294967295, %s699_s15   ;;  %s520_s17 = sadd.s32 4294967294, %s699_s15   ;;  %s699_s15 = sphi %s731_s15, %s979_s15   ;;  %s695_s14 = sphi %s729_s14, %s978_s14   ;;  %s691_s13 = sphi %s727_s13, %s977_s13   ;;  %s687_s12 = sphi %s725_s12, %s976_s12  }
   0x6   : > { %s750_s18 = sadd.s32 1, %s699_s15   ;;  %s26_s19 = sadd.s32 1, %s695_s14 }
   0x7   : > { %s23_s20 = ssub.s32 %s699_s15, %s750_s18  ;;  %p33_p0 = scmp.ne.s32.totalorder %s695_s14, %s691_s13 }
   0x8   : > { %p24_p1 = scmp.eq.s32.totalorder %s23_s20, 0  ;;  %p34_p2 = scmp.eq.s32.totalorder %s699_s15, 0 }
   0x9   : > { %p39_p3 = scmp.ne.s32.totalorder %s691_s13, %s687_s12  ;;  %p40_p4 = scmp.eq.s32.totalorder %s746_s16, 0 }
   0xa   : > { %s762_s21 = scalar_select %p24_p1, %s695_s14, %s26_s19  }
   0xb   : > { %p764_p5 = por %p34_p2, %p33_p0  ;;  %p768_p6 = por %p40_p4, %p39_p3 }
   0xc   : > { %p105_p7 = scmp.eq.s32.totalorder %s746_s16, 1  ;;  %p111_p8 = scmp.eq.s32.totalorder %s520_s17, 1 }
   0xd   : > { %p552_p10 = scmp.lt.s32.totalorder %s699_s15, 2  ;;  %s137_s26 = sand.u32 1, %s695_s14  }
   0xe   : > { %p775_p11 = por %p105_p7, %p33_p0  ;;  %p779_p12 = por %p111_p8, %p39_p3 }
   0xf   : > { %s538_s27 = sshll.u32 %s699_s15, 7  ;;  %s523_s28 = sshll.u32 %s137_s26, 7 }
  0x10   : > { %s146_s4 = scalar_lea.hbm %s966_s0, %s538_s27  ;;  %s141_s6 = scalar_lea.vmem [#allocation2], %s523_s28 }
  0x11   : > { %s147_s5 = sshll.u32 %s146_s4, 4  ;;  %s149_s7 = sshll.u32 %s141_s6, 4  ;;  %s148_s5 = int_to_ptr.hbm [resolvable:$true] %s147_s5  ;;  %s150_s7 = int_to_ptr.vmem [resolvable:$true] %s149_s7 }
  0x12   : > { %p790_p13 = pnand %p552_p10, %p764_p5  ;;  %p526_p0 = scmp.ge.s32.totalorder %s699_s15, 1 }
  0x13   : > { %p157_p1 = scmp.lt.s32.totalorder %s699_s15, 3  ;;  %s138_s9 = scalar_lea.sflag [#allocation3], %s137_s26 }
  0x14   : > { %s603_s10 = sshra.s32 %s148_s5, 4  ;;  %p607_p3 = pneg %p790_p13  ;;  %s604_s10 = int_to_ptr.hbm [resolvable:$true] %s603_s10 }
  0x15   : > { %s605_s11 = scalar_lea.hbm %s604_s10, 128  ;;  %s610_s20 = scalar_lea.hbm %s966_s0, 256 }
  0x16   : > { %p606_p2 = scmp.ne.s32.totalorder %s604_s10, %s605_s11  ;;  %p611_p5 = scmp.lt.s32.totalorder %s604_s10, %s966_s0 }
  0x17   : > { %p612_p8 = scmp.lt.s32.totalorder %s610_s20, %s605_s11 }
  0x18   : > { %p608_p4 = pnand %p607_p3, %p606_p2 }
  0x19   : > { %p613_p10 = por %p612_p8, %p611_p5 }
  0x1a   : > { %p609_p7 = pneg %p608_p4 }
  0x1c   : > { %p614_p9 = pnand %p613_p10, %p609_p7 }
  0x1e   : > { %617 = shalt.err (!%p614_p9)
}
  0x1f   : > { %s701_s26 = smov 256   ;;  %s702_s28 = smov 16  }
  0x20   : > { %547 = dma.hbm_to_vmem [thread:$0]  (!%p790_p13), %s148_s5, 2048, %s150_s7, %s138_s9, %s701_s26, %s701_s26, %s702_s28  }
  0x21   : > { %p158_p2 = pnand %p526_p0, %p157_p1 }
  0x22   : > { %s811_s29 = sand.u32 (!%p158_p2), 1, %s691_s13  }
  0x23   : > { %161 = sbr.rel (%p158_p2) target bundleno = 618 (0x26a), region = 32  ;;  %s527_s30 = sshll.u32 (!%p158_p2), %s811_s29, 7 }
  0x24   : > { %s164_s4 = scalar_lea.sflag (!%p158_p2), [#allocation3], %s811_s29  ;;  %s167_s6 = scalar_lea.vmem (!%p158_p2), [#allocation2], %s527_s30 }
  0x28   : > { %678 = dma.done.wait (%p768_p6), %s164_s4, 2048  }
  0x29   : > { %680 = vsyncadd (%p768_p6), %s164_s4, 4294965248  ;;  %v821_v0 = vld [vmem:[%s167_s6] sm:$0xff]  ;;  %v823_v1 = vld [vmem:[%s167_s6 + $0x8] sm:$0xff]  ;;  %v247_v32 = vlaneseq  ;;  %vm252_vm0 = vcmask 130112   ;;  %vm256_vm1 = vcmask 195712   ;;  %vm260_vm2 = vcmask 261312  }
  0x2a   : > { %v825_v2 = vld [vmem:[%s167_s6 + $0x20] sm:$0xff]  ;;  %v207_v3 = vadd.f32 %v823_v1, %v821_v0  ;;  %v829_v4 = vld [vmem:[%s167_s6 + $0x28] sm:$0xff]  ;;  %v839_v9 = vld [vmem:[%s167_s6 + $0x10] sm:$0xff]  ;;  %vm264_vm3 = vcmask 326912   ;;  %vm268_vm4 = vcmask 392512   ;;  %vm272_vm5 = vcmask 458112  }
  0x2b   : > { %v831_v5 = vld [vmem:[%s167_s6 + $0x40] sm:$0xff]  ;;  %v833_v6 = vld [vmem:[%s167_s6 + $0x48] sm:$0xff]  ;;  %v213_v7 = vadd.f32 %v829_v4, %v825_v2  ;;  %v841_v10 = vld [vmem:[%s167_s6 + $0x18] sm:$0xff]  ;;  %v248_v36 = vand.u32 127, %v247_v32  ;;  %vm276_vm6 = vcmask 523712   ;;  %vm278_vm7 = vcmask 523264  }
  0x2c   : > { %v219_v8 = vadd.f32 %v833_v6, %v831_v5  ;;  %208 = vadd.xlane.f32.xlu0 %v207_v3  ;;  %v843_v11 = vld [vmem:[%s167_s6 + $0x30] sm:$0xff]  ;;  %v845_v12 = vld [vmem:[%s167_s6 + $0x38] sm:$0xff]  ;;  %v210_v15 = vadd.f32 %v841_v10, %v839_v9  ;;  %v857_v18 = vld [vmem:[%s167_s6 + $0x60] sm:$0xff]  ;;  %vm307_vm8 = vcmask 1043456   ;;  %vm303_vm9 = vcmask 31744   ;;  %s900_s7 = scalar_lea.vmem [#allocation5], %s527_s30 }
  0x2d   : > { %214 = vadd.xlane.f32.xlu1 %v213_v7  ;;  %v847_v13 = vld [vmem:[%s167_s6 + $0x50] sm:$0xff]  ;;  %v849_v14 = vld [vmem:[%s167_s6 + $0x58] sm:$0xff]  ;;  %v216_v16 = vadd.f32 %v845_v12, %v843_v11  ;;  %v859_v19 = vld [vmem:[%s167_s6 + $0x68] sm:$0xff]  ;;  %v250_v37 = vadd.s32 4294967288, %v248_v36  ;;  %v254_v38 = vadd.s32 4294967280, %v248_v36  ;;  %v258_v39 = vadd.s32 4294967272, %v248_v36 }
  0x2e   : > { %220 = vadd.xlane.f32.xlu2 %v219_v8  ;;  %v222_v17 = vadd.f32 %v849_v14, %v847_v13  ;;  %v861_v20 = vld [vmem:[%s167_s6 + $0x70] sm:$0xff]  ;;  %v863_v21 = vld [vmem:[%s167_s6 + $0x78] sm:$0xff]  ;;  %v225_v22 = vadd.f32 %v859_v19, %v857_v18  ;;  %v236_v26 = vld [vmem:[%s967_s1 + $0x28] sm:$0xff]  ;;  %v262_v42 = vadd.s32 4294967264, %v248_v36  ;;  %v266_v47 = vadd.s32 4294967256, %v248_v36  ;;  %s539_s30 = sshll.u32 %s746_s16, 7 }
  0x2f   : > { %v228_v23 = vadd.f32 %v863_v21, %v861_v20  ;;  %v238_v24 = vld [vmem:[%s967_s1 + $0x38] sm:$0xff]  ;;  %v237_v25 = vld [vmem:[%s967_s1 + $0x30] sm:$0xff]  ;;  %v235_v27 = vld [vmem:[%s967_s1 + $0x20] sm:$0xff]  ;;  %v270_v53 = vadd.s32 4294967248, %v248_v36  ;;  %v274_v55 = vadd.s32 4294967240, %v248_v36  ;;  %s443_s10 = scalar_lea.hbm %s969_s3, %s539_s30  ;;  %s444_s11 = sshll.u32 %s900_s7, 4  ;;  %s445_s11 = int_to_ptr.vmem [resolvable:$true] %s444_s11 }
  0x30   : > { %289 = vmatpush.msra.mxu0 %v238_v24  ;;  %v234_v28 = vld [vmem:[%s967_s1 + $0x18] sm:$0xff]  ;;  %v233_v29 = vld [vmem:[%s967_s1 + $0x10] sm:$0xff]  ;;  %v232_v30 = vld [vmem:[%s967_s1 + $0x8] sm:$0xff]  ;;  %s446_s17 = sshll.u32 %s443_s10, 4  ;;  %s432_s16 = scalar_lea.sflag [#allocation4], %s811_s29  ;;  %s447_s17 = int_to_ptr.hbm [resolvable:$true] %s446_s17 }
  0x31   : > { %v231_v31 = vld [vmem:[%s967_s1] sm:$0xff]  ;;  %s647_s19 = sshra.s32 %s447_s17, 4  ;;  %s653_s26 = scalar_lea.hbm %s969_s3, 256  ;;  %s648_s19 = int_to_ptr.hbm [resolvable:$true] %s647_s19 }
  0x32   : > { %290 = vmatpush.msra.mxu0 %v237_v25  ;;  %v302_v3 = vld [vmem:[%s968_s2] sm:$0xf]  ;;  %s649_s20 = scalar_lea.hbm %s648_s19, 128  ;;  %p654_p0 = scmp.lt.s32.totalorder %s648_s19, %s969_s3 }
  0x33   : > { %530 = vmatpush.msk.msra.mxu1 %vm307_vm8, %v302_v3  ;;  %p650_p6 = scmp.ne.s32.totalorder %s648_s19, %s649_s20  ;;  %p655_p1 = scmp.lt.s32.totalorder %s653_s26, %s649_s20 }
  0x34   : > { %211 = vadd.xlane.f32.xlu0 %v210_v15  ;;  %291 = vmatpush.msra.mxu0 %v236_v26  ;;  %v352_v15 = vshrl.u32 %v247_v32, 7 }
  0x35   : > { %217 = vadd.xlane.f32.xlu1 %v216_v16  ;;  %p651_p9 = pnand %p650_p6, %p775_p11  ;;  %p656_p3 = por %p655_p1, %p654_p0 }
  0x36   : > { %223 = vadd.xlane.f32.xlu2 %v222_v17  ;;  %292 = vmatpush.msra.mxu0 %v235_v27  ;;  %v365_v16 = vadd.s32 16, %v352_v15  ;;  %v359_v17 = vadd.s32 8, %v352_v15 }
  0x37   : > { %590 = vset.pattern.permute.xlu2 %v352_v15  ;;  %p652_p13 = pneg %p651_p9 }
  0x38   : > { %293 = vmatpush.msra.mxu0 %v234_v28  ;;  %592 = vset.pattern.permute.xlu1 %v365_v16 }
  0x39   : > { %591 = vset.pattern.permute.xlu0 %v359_v17  ;;  %p657_p4 = pnand %p656_p3, %p652_p13 }
  0x3a   : > { %294 = vmatpush.msra.mxu0 %v233_v29 }
  0x3c   : > { %226 = vadd.xlane.f32.xlu0 %v225_v22  ;;  %295 = vmatpush.msra.mxu0 %v232_v30 }
  0x3d   : > { %229 = vadd.xlane.f32.xlu1 %v228_v23 }
  0x3e   : > { %296 = vmatpush.msra.mxu0 %v231_v31 }
  0x9f   : > { %v209_v33 = vpop.xlane.xlu0 %208 }
  0xa0   : > { %v215_v34 = vpop.xlane.xlu1 %214  ;;  %v249_v41 = vperm.slane %v209_v33, %v248_v36 }
  0xa1   : > { %v221_v35 = vpop.xlane.xlu2 %220  ;;  %v255_v45 = vperm.slane %v215_v34, %v254_v38  ;;  %v371_v38 = vadd.s32 24, %v352_v15 }
  0xa2   : > { %v263_v51 = vperm.slane %v221_v35, %v262_v42 }
  0xa7   : > { %v212_v40 = vpop.xlane.xlu0 %211 }
  0xa8   : > { %v251_v43 = vperm.slane %v212_v40, %v250_v37  ;;  %v218_v44 = vpop.xlane.xlu1 %217  ;;  %v383_v37 = vadd.s32 40, %v352_v15  ;;  %v377_v40 = vadd.s32 32, %v352_v15 }
  0xa9   : > { %v259_v46 = vperm.slane %v218_v44, %v258_v39  ;;  %v224_v49 = vpop.xlane.xlu2 %223  ;;  %v395_v39 = vadd.s32 56, %v352_v15 }
  0xaa   : > { %v253_v48 = vsel %vm252_vm0, %v251_v43, %v249_v41  ;;  %v267_v54 = vperm.slane %v224_v49, %v266_v47  ;;  %v389_v41 = vadd.s32 48, %v352_v15 }
  0xab   : > { %v257_v50 = vsel %vm256_vm1, %v255_v45, %v253_v48 }
  0xac   : > { %v261_v52 = vsel %vm260_vm2, %v259_v46, %v257_v50 }
  0xad   : > { %v265_v56 = vsel %vm264_vm3, %v263_v51, %v261_v52 }
  0xae   : > { %v269_v60 = vsel %vm268_vm4, %v267_v54, %v265_v56 }
  0xaf   : > { %v227_v57 = vpop.xlane.xlu0 %226 }
  0xb0   : > { %v271_v58 = vperm.slane %v227_v57, %v270_v53  ;;  %v230_v59 = vpop.xlane.xlu1 %229 }
  0xb1   : > { %v275_v61 = vperm.slane %v230_v59, %v274_v55 }
  0xb2   : > { %v273_v62 = vsel %vm272_vm5, %v271_v58, %v269_v60 }
  0xb3   : > { %v277_v63 = vsel %vm276_vm6, %v275_v61, %v273_v62 }
  0xb4   : > { %529 = vmatmul.msk.f32.vlgmr.msra.gmra.mxu0 %vm278_vm7, %v277_v63 }
 0x131   : > { %v298_v7 = vpop.f32.mrf.mxu0 }
 0x132   : > { %v301_v8 = vmax.f32 %v298_v7, 0.0 }
 0x134   : > { %531 = vmatmul.msk.f32.vlgmr.msra.gmra.mxu1 %vm303_vm9, %v301_v8 }
 0x1b1   : > { %v328_v22 = vpop.f32.mrf.mxu1 }
 0x1b2   : > { %v532_v23 = vmul.f32 -1.442695, %v328_v22 }
 0x1b4   : > { %599 = vpow2.f32 %v532_v23 }
 0x1ba   : > { %v600_v24 = vpop.eup %599 }
 0x1bb   : > { %v334_v25 = vadd.f32 1.0, %v600_v24 }
 0x1bd   : > { %601 = vrcp.f32 %v334_v25  ;;  %v346_v29 = vand.u32 2147483648, %v334_v25  ;;  %v344_v31 = vand.u32 2147483647, %v334_v25  ;;  %vm340_vm11 = vweird.f32 %v334_v25 }
 0x1bf   : > { %v347_v32 = vor.u32 1.1754944e-38, %v346_v29  ;;  %vm345_vm13 = vcmp.eq.f32.partialorder %v344_v31, 8.507059e+37 }
 0x1c3   : > { %v602_v26 = vpop.eup %601 }
 0x1c4   : > { %v336_v27 = vmul.f32 %v602_v26, %v334_v25  ;;  %vm341_vm10 = vweird.f32 %v602_v26 }
 0x1c5   : > { %vm342_vm12 = vmor %vm340_vm11, %vm341_vm10 }
 0x1c6   : > { %v337_v28 = vsub.f32 1.0, %v336_v27 }
 0x1c8   : > { %v338_v30 = vmul.f32 %v602_v26, %v337_v28 }
 0x1ca   : > { %v339_v33 = vadd.f32 %v602_v26, %v338_v30 }
 0x1cc   : > { %v343_v34 = vsel %vm342_vm12, %v602_v26, %v339_v33 }
 0x1cd   : > { %v348_v35 = vsel %vm345_vm13, %v347_v32, %v343_v34 }
 0x1ce   : > { %v350_v36 = vperm.slane %v348_v35, 0 }
 0x1d0   : > { %367 = vperm.xlu1 %592, %v350_v36   ;;  %361 = vperm.xlu0 %591, %v350_v36  }
 0x1d1   : > { %355 = vperm.xlu2 %590, %v350_v36  }
 0x1d8   : > { %595 = vset.pattern.permute.xlu1 %v383_v37  ;;  %598 = vset.pattern.permute.xlu0 %v395_v39 }
 0x1d9   : > { %593 = vset.pattern.permute.xlu2 %v371_v38 }
 0x1e0   : > { %385 = vperm.xlu1 %595, %v350_v36  }
 0x1e1   : > { %373 = vperm.xlu2 %593, %v350_v36  }
 0x1e8   : > { %597 = vset.pattern.permute.xlu1 %v395_v39 }
 0x1e9   : > { %594 = vset.pattern.permute.xlu2 %v377_v40 }
 0x1f0   : > { %397 = vperm.xlu1 %597, %v350_v36  }
 0x1f1   : > { %379 = vperm.xlu2 %594, %v350_v36  }
 0x1f9   : > { %596 = vset.pattern.permute.xlu2 %v389_v41 }
 0x201   : > { %391 = vperm.xlu2 %596, %v350_v36  }
 0x22b   : > { %v356_v42 = vpop.permute.xlu2 %355 }
 0x22c   : > { %v399_v43 = vmul.f32 %v356_v42, %v821_v0  ;;  %v400_v44 = vmul.f32 %v356_v42, %v823_v1 }
 0x22e   : > { %415 = vst [vmem:[%s900_s7] sm:$0xff] %v399_v43 }
 0x22f   : > { %416 = vst [vmem:[%s900_s7 + $0x8] sm:$0xff] %v400_v44 }
 0x23b   : > { %v374_v45 = vpop.permute.xlu2 %373 }
 0x23c   : > { %v405_v46 = vmul.f32 %v374_v45, %v843_v11  ;;  %v406_v0 = vmul.f32 %v374_v45, %v845_v12 }
 0x23e   : > { %421 = vst [vmem:[%s900_s7 + $0x30] sm:$0xff] %v405_v46 }
 0x23f   : > { %422 = vst [vmem:[%s900_s7 + $0x38] sm:$0xff] %v406_v0 }
 0x242   : > { %v368_v1 = vpop.permute.xlu1 %367  ;;  %v362_v47 = vpop.permute.xlu0 %361 }
 0x243   : > { %v403_v48 = vmul.f32 %v368_v1, %v825_v2  ;;  %v404_v49 = vmul.f32 %v368_v1, %v829_v4  ;;  %v401_v50 = vmul.f32 %v362_v47, %v839_v9  ;;  %v402_v51 = vmul.f32 %v362_v47, %v841_v10 }
 0x245   : > { %419 = vst [vmem:[%s900_s7 + $0x20] sm:$0xff] %v403_v48 }
 0x246   : > { %420 = vst [vmem:[%s900_s7 + $0x28] sm:$0xff] %v404_v49 }
 0x247   : > { %417 = vst [vmem:[%s900_s7 + $0x10] sm:$0xff] %v401_v50 }
 0x248   : > { %418 = vst [vmem:[%s900_s7 + $0x18] sm:$0xff] %v402_v51 }
 0x24b   : > { %v380_v11 = vpop.permute.xlu2 %379 }
 0x24c   : > { %v407_v12 = vmul.f32 %v380_v11, %v831_v5  ;;  %v408_v2 = vmul.f32 %v380_v11, %v833_v6 }
 0x24e   : > { %423 = vst [vmem:[%s900_s7 + $0x40] sm:$0xff] %v407_v12 }
 0x24f   : > { %424 = vst [vmem:[%s900_s7 + $0x48] sm:$0xff] %v408_v2 }
 0x252   : > { %v386_v4 = vpop.permute.xlu1 %385 }
 0x253   : > { %v409_v9 = vmul.f32 %v386_v4, %v847_v13  ;;  %v410_v52 = vmul.f32 %v386_v4, %v849_v14 }
 0x255   : > { %425 = vst [vmem:[%s900_s7 + $0x50] sm:$0xff] %v409_v9 }
 0x256   : > { %426 = vst [vmem:[%s900_s7 + $0x58] sm:$0xff] %v410_v52 }
 0x25b   : > { %v392_v10 = vpop.permute.xlu2 %391 }
 0x25c   : > { %v411_v53 = vmul.f32 %v392_v10, %v857_v18  ;;  %v412_v5 = vmul.f32 %v392_v10, %v859_v19 }
 0x25e   : > { %427 = vst [vmem:[%s900_s7 + $0x60] sm:$0xff] %v411_v53 }
 0x25f   : > { %428 = vst [vmem:[%s900_s7 + $0x68] sm:$0xff] %v412_v5 }
 0x262   : > { %v398_v6 = vpop.permute.xlu1 %397 }
 0x263   : > { %v413_v13 = vmul.f32 %v398_v6, %v861_v20  ;;  %v414_v14 = vmul.f32 %v398_v6, %v863_v21 }
 0x265   : > { %429 = vst [vmem:[%s900_s7 + $0x70] sm:$0xff] %v413_v13 }
 0x266   : > { %430 = vst [vmem:[%s900_s7 + $0x78] sm:$0xff] %v414_v14 }
 0x267   : > { %660 = shalt.err (!%p657_p4)
}
 0x268   : > { %s703_s29 = smov 256   ;;  %s704_s6 = smov 16  }
 0x269   : > { %542 = dma.vmem_to_hbm [thread:$0]  (%p775_p11), %s445_s11, 2048, %s447_s17, %s432_s16, %s703_s29, %s703_s29, %s704_s6  }
 0x26a PF: > { %s461_s23 = sand.u32 1, %s687_s12   ;;  %p975_p7 = scmp.ge.s32.totalorder %s699_s15, 2 }
 0x26b   : > { %s462_s5 = scalar_lea.sflag [#allocation4], %s461_s23 }
 0x26c   : > { %p549_p5 = pnand %p975_p7, %p779_p12 }
 0x26e   : > { %p550_p8 = pneg %p549_p5 }
 0x270   : > { %682 = dma.done.wait (%p550_p8), %s462_s5, 2048  }
 0x271   : > { %684 = vsyncadd (%p550_p8), %s462_s5, 4294965248  ;;  %p16_p10 = scmp.ge.s32.totalorder %s750_s18, 4   ;;  %s976_s12 = smov %s691_s13 }
 0x272   : > { %s977_s13 = smov %s695_s14  ;;  %s978_s14 = smov %s762_s21 }
 0x273   : > { %s979_s15 = smov %s750_s18  ;;  %18 = sbr.rel (!%p16_p10) target bundleno = 5 (0x5), region = 77 }
 0x278   :  { %468 = vsyncpa [#allocation3], 1 }
 0x279   :  { %470 = vsyncpa [#allocation3 + $0x1], 1 }
 0x27a   :  { %471 = vsyncpa [#allocation4], 1 }
 0x27b   :  { %473 = vsyncpa [#allocation4 + $0x1], 1 }

</bundles_post_ra>
